<compile_context>
chip_gen: v7x
topology: tpu7x:2x2x1
jax: 0.10.0
libtpu: 0.0.40
codegen_flags: <defaults>
</compile_context>

<pallas_src>
import numpy as np

import jax
import jax.numpy as jnp
from jax.experimental import pallas as pl
from jax.experimental.pallas import tpu as pltpu


# -----------------------------------------------------------------------------
# Host-side weight preprocessing (runs once, outside the hot path)
# -----------------------------------------------------------------------------
def _circulant_tap_matrices(w, width, cin_pad=None):
    """(3,3,Cin,Cout) conv weight -> (3, W*Cin, W*Cout) per-ky circulant mats.

    For vertical tap ky, entry [ky, w_in*Cin + ci, w_out*Cout + co] holds
    w[ky, kx, ci, co] with w_in = (w_out + kx - 1) mod W, i.e. the circular
    padding along W is folded into the band, so each ky tap of the 3x3 conv is
    one MXU matmul over lane-dense (rows, W*Cin) slabs.  Only the H halo is
    handled inside the kernel (applied to the per-tap outputs).
    """
    w = np.asarray(w, np.float32)                      # (K, K, Cin, Cout)
    k, _, cin, cout = w.shape
    if cin_pad is not None and cin_pad > cin:
        w = np.concatenate(
            [w, np.zeros((k, k, cin_pad - cin, cout), np.float32)], axis=2)
        cin = cin_pad
    pad = k // 2
    mats = np.zeros((k, width, cin, width, cout), np.float32)
    for ky in range(k):
        for kx in range(k):
            for wo in range(width):
                wi = (wo + kx - pad) % width
                mats[ky, wi, :, wo, :] += w[ky, kx]
    return mats.reshape(k, width * cin, width * cout)


def prepare_sn_conv_block_params(w1, b1, w2, b2, gamma, beta, width):
    """Kernel-ready operands: per-tap circulant conv matrices (bf16) and
    lane-tiled bias / gamma / beta rows (f32).  Pure parameter preprocessing.

    # TODO(synk): apply spectral normalization (W / sigma(W) via the PyTorch
    # u/v power-iteration buffers) to w1/w2 here when those buffers are
    # available; they are stateful and not part of the forward compute graph.
    """
    w1 = np.asarray(w1, np.float32)
    w2 = np.asarray(w2, np.float32)
    cin, cout = int(w1.shape[2]), int(w1.shape[3])
    assert width & (width - 1) == 0, "width must be a power of two (lane butterfly)"

    # Zero-pad Cin so the conv1 LHS slab is a whole number of 128-lane tiles
    # (4 -> 8 here); padded channels are zero in both input and weights.
    lane = 128
    if lane % width == 0:
        cpl = lane // width
        cin_pad = ((cin + cpl - 1) // cpl) * cpl
    else:
        cin_pad = cin

    bw1 = jnp.asarray(_circulant_tap_matrices(w1, width, cin_pad), jnp.bfloat16)
    bw2 = jnp.asarray(_circulant_tap_matrices(w2, width), jnp.bfloat16)

    def lane_row(v):  # (C,) -> (1, W*C): lane (w*C + c) holds v[c]
        return jnp.asarray(np.tile(np.asarray(v, np.float32), width)[None, :])

    return (bw1, lane_row(b1), bw2, lane_row(b2), lane_row(gamma), lane_row(beta))


# -----------------------------------------------------------------------------
# Pallas kernel: whole block forward, lane-dense slabs resident in VMEM
# -----------------------------------------------------------------------------
def _make_sn_conv_block_kernel(n, h, width, cout):
    wcout = width * cout
    inv_cnt = 1.0 / float(n * h * width)          # multiply, don't divide

    def lane_allreduce_per_channel(row):
        # (1, W*Cout) f32 -> same shape; after log2(W) XLU lane-rotate+add
        # steps every lane holds its channel's total replicated across all W
        # groups, so no separate re-tiling is needed.
        shift = (width // 2) * cout
        while shift >= cout:
            row = row + pltpu.roll(row, shift, axis=1)
            shift //= 2
        return row

    def kernel(x_ref, bw1_ref, b1_ref, bw2_ref, b2_ref, g_ref, bt_ref, o_ref):
        def conv3x3_circ_relu(slab_bf, bw_ref, brow_ref):
            # slab_bf: (N*H, W*Cin) bf16, lane-dense.  One bf16 MXU matmul per
            # vertical tap (W halo folded into the circulant weights), f32 acc.
            y_top = jnp.dot(slab_bf, bw_ref[0], preferred_element_type=jnp.float32)
            y_mid = jnp.dot(slab_bf, bw_ref[1], preferred_element_type=jnp.float32)
            y_bot = jnp.dot(slab_bf, bw_ref[2], preferred_element_type=jnp.float32)
            # Circular H halo on the narrow f32 tap OUTPUTS:
            #   out[i] = mid[i] + top[i-1] + bot[i+1]   (rows wrap per image)
            # so the matmul LHS is never shifted/replicated and is cast to bf16
            # exactly once; the row shifts below move 3x less data than an
            # input-side halo and stay on the tile-aligned slice+concat path.
            top3 = y_top.reshape(n, h, wcout)
            bot3 = y_bot.reshape(n, h, wcout)
            t_sh = jnp.concatenate([top3[:, h - 1:], top3[:, :h - 1]], axis=1)  # top[i-1]
            b_sh = jnp.concatenate([bot3[:, 1:], bot3[:, :1]], axis=1)          # bot[i+1]
            y = y_mid + (t_sh + b_sh).reshape(n * h, wcout)
            return jnp.maximum(y + brow_ref[...], 0.0)                  # bias + ReLU fused

        h1 = conv3x3_circ_relu(x_ref[...], bw1_ref, b1_ref)               # x already bf16
        h2 = conv3x3_circ_relu(h1.astype(jnp.bfloat16), bw2_ref, b2_ref)  # single cast

        # --- BatchNorm2d: training-mode batch stats (biased var, eps=1e-5),
        # two-pass (mean, then centered variance) since h2 is fully resident;
        # avoids E[x^2]-mean^2 cancellation on post-ReLU activations.
        s = jnp.sum(h2, axis=0, keepdims=True)                    # (1, W*Cout)
        mean_row = lane_allreduce_per_channel(s) * inv_cnt        # lane-replicated per channel
        d = h2 - mean_row
        v = jnp.sum(d * d, axis=0, keepdims=True)
        var_row = lane_allreduce_per_channel(v) * inv_cnt
        scale_row = g_ref[...] * jax.lax.rsqrt(var_row + 1e-5)
        shift_row = bt_ref[...] - mean_row * scale_row
        # lane-dense (N*H, W*Cout) store: last dim = 128 -> unmasked vst
        o_ref[...] = h2 * scale_row + shift_row

    return kernel


# -----------------------------------------------------------------------------
# Wrapper (NCHW in / NCHW out, like the PyTorch module)
# -----------------------------------------------------------------------------
@jax.jit
def sn_conv_block_forward(x_nchw, params):
    """NCHW in / NCHW out.  When blocks are chained, keep the lane-dense
    (N*H, W*C) slab between blocks so these transposes only appear at model
    boundaries."""
    bw1, b1row, bw2, b2row, g_row, bt_row = params
    n, cin, hgt, wid = x_nchw.shape
    wcout = b1row.shape[1]
    cout = wcout // wid
    cin_pad = bw1.shape[1] // wid

    # NCHW -> lane-dense bf16 slab (N*H, W*Cin_pad); bf16 here halves the
    # HBM->VMEM DMA and removes the in-kernel cast of the conv1 operand
    # (accumulation and BatchNorm stay f32 inside the kernel).
    x_nhwc = jnp.transpose(x_nchw, (0, 2, 3, 1)).astype(jnp.bfloat16)
    if cin_pad > cin:
        x_nhwc = jnp.pad(x_nhwc, ((0, 0), (0, 0), (0, 0), (0, cin_pad - cin)))
    x_slab = x_nhwc.reshape(n * hgt, wid * cin_pad)

    kernel = _make_sn_conv_block_kernel(n, hgt, wid, cout)
    vmem = pl.BlockSpec(memory_space=pltpu.MemorySpace.VMEM)
    out_slab = pl.pallas_call(
        kernel,
        out_shape=jax.ShapeDtypeStruct((n * hgt, wcout), jnp.float32),
        in_specs=[vmem] * 7,
        out_specs=vmem,
    )(x_slab, bw1, b1row, bw2, b2row, g_row, bt_row)

    # dense (N*H, W*Cout) slab -> NCHW
    return jnp.transpose(out_slab.reshape(n, hgt, wid, cout), (0, 3, 1, 2))


# -----------------------------------------------------------------------------
# Pure-JAX reference (independent implementation: circular pad + 9 einsums).
# Conv operands rounded to bf16 exactly like the kernel; accumulation and
# BatchNorm stay f32.
# -----------------------------------------------------------------------------
def sn_conv_block_reference(x_nchw, w1, b1, w2, b2, gamma, beta):
    x = jnp.transpose(x_nchw, (0, 2, 3, 1)).astype(jnp.float32)   # NHWC

    def circ_conv3x3_relu(t, w, b):
        nb, hh, ww, _ = t.shape
        tp = jnp.concatenate([t[:, -1:], t, t[:, :1]], axis=1)
        tp = jnp.concatenate([tp[:, :, -1:], tp, tp[:, :, :1]], axis=2)
        acc = jnp.zeros((nb, hh, ww, w.shape[-1]), jnp.float32)
        for ky in range(3):
            for kx in range(3):
                patch = tp[:, ky:ky + hh, kx:kx + ww, :].astype(jnp.bfloat16)
                acc = acc + jnp.einsum("nhwc,cd->nhwd", patch,
                                       w[ky, kx].astype(jnp.bfloat16),
                                       preferred_element_type=jnp.float32)
        return jnp.maximum(acc + b.reshape(1, 1, 1, -1), 0.0)

    h1 = circ_conv3x3_relu(x, w1, b1)
    h2 = circ_conv3x3_relu(h1, w2, b2)
    mean = jnp.mean(h2, axis=(0, 1, 2), keepdims=True)
    var = jnp.mean((h2 - mean) ** 2, axis=(0, 1, 2), keepdims=True)   # biased
    out = (h2 - mean) * jax.lax.rsqrt(var + 1e-5)
    out = out * gamma.reshape(1, 1, 1, -1) + beta.reshape(1, 1, 1, -1)
    return jnp.transpose(out, (0, 3, 1, 2))


if __name__ == "__main__":
    # SNConvBlock(in_ch=4, out_ch=8, norm='bn', ksize=3)-equivalent forward.
    N, C_IN, C_OUT, H, W = 2, 4, 8, 16, 16
    KSIZE = 3

    key = jax.random.PRNGKey(0)
    k_x, k_w1, k_b1, k_w2, k_b2, k_g, k_bt = jax.random.split(key, 7)

    x = jax.random.normal(k_x, (N, C_IN, H, W), jnp.float32)

    # Conv weights stored as (kh, kw, Cin, Cout)  (PyTorch Conv2d weight is
    # (Cout, Cin, kh, kw) -> transpose(2, 3, 1, 0)).
    w1 = 0.1 * jax.random.normal(k_w1, (KSIZE, KSIZE, C_IN, C_OUT), jnp.float32)
    b1 = 0.1 * jax.random.normal(k_b1, (C_OUT,), jnp.float32)
    w2 = 0.1 * jax.random.normal(k_w2, (KSIZE, KSIZE, C_OUT, C_OUT), jnp.float32)
    b2 = 0.1 * jax.random.normal(k_b2, (C_OUT,), jnp.float32)
    # BatchNorm affine parameters (learnable; non-trivial values exercise the
    # lane-tiled scale/shift path).
    gamma = 1.0 + 0.1 * jax.random.normal(k_g, (C_OUT,), jnp.float32)
    beta = 0.1 * jax.random.normal(k_bt, (C_OUT,), jnp.float32)

    params = prepare_sn_conv_block_params(w1, b1, w2, b2, gamma, beta, W)

    out = jax.block_until_ready(sn_conv_block_forward(x, params))
    ref = sn_conv_block_reference(x, w1, b1, w2, b2, gamma, beta)

    assert out.shape == (N, C_OUT, H, W)
    err = float(jnp.max(jnp.abs(out - ref)))
    # Tolerance covers bf16-operand double-rounding / accumulation-order
    # differences between the two independent implementations (accumulation
    # and BatchNorm are f32 in both); typical max error is ~1e-5.
    assert jnp.allclose(out, ref, atol=1e-3, rtol=1e-3), (
        "mismatch vs reference, max abs err = %e" % err)

    print("KERNEL_OK")
</pallas_src>

<mosaic_0001>
module attributes {stable_mosaic.version = 11 : i64} {
  func.func @kernel(%arg0: memref<32x128xbf16, #tpu.memory_space<vmem>>, %arg1: memref<3x128x128xbf16, #tpu.memory_space<vmem>>, %arg2: memref<1x128xf32, #tpu.memory_space<vmem>>, %arg3: memref<3x128x128xbf16, #tpu.memory_space<vmem>>, %arg4: memref<1x128xf32, #tpu.memory_space<vmem>>, %arg5: memref<1x128xf32, #tpu.memory_space<vmem>>, %arg6: memref<1x128xf32, #tpu.memory_space<vmem>>, %arg7: memref<32x128xf32, #tpu.memory_space<vmem>>) attributes {dimension_semantics = [], scalar_prefetch = 0 : i64, scratch_operands = 0 : i64, tpu.core_type = #tpu.core_type<tc>} {
    %c0 = arith.constant 0 : index
    %c0_0 = arith.constant 0 : index
    %0 = vector.load %arg0[%c0, %c0_0] : memref<32x128xbf16, #tpu.memory_space<vmem>>, vector<32x128xbf16>
    %c0_1 = arith.constant 0 : index
    %c0_2 = arith.constant 0 : index
    %c0_3 = arith.constant 0 : index
    %1 = vector.load %arg1[%c0_1, %c0_2, %c0_3] : memref<3x128x128xbf16, #tpu.memory_space<vmem>>, vector<1x128x128xbf16>
    %2 = vector.shape_cast %1 : vector<1x128x128xbf16> to vector<128x128xbf16>
    %cst = arith.constant dense<0.000000e+00> : vector<32x128xf32>
    %3 = tpu.matmul %0, %2, %cst {dimension_numbers = #tpu.dot_dimension_numbers<[1], [0], [0], [1], [0, 0, 1, 1], [], []>} : vector<32x128xbf16>, vector<128x128xbf16>, vector<32x128xf32> -> vector<32x128xf32>
    %c1 = arith.constant 1 : index
    %c0_4 = arith.constant 0 : index
    %c0_5 = arith.constant 0 : index
    %4 = vector.load %arg1[%c1, %c0_4, %c0_5] : memref<3x128x128xbf16, #tpu.memory_space<vmem>>, vector<1x128x128xbf16>
    %5 = vector.shape_cast %4 : vector<1x128x128xbf16> to vector<128x128xbf16>
    %cst_6 = arith.constant dense<0.000000e+00> : vector<32x128xf32>
    %6 = tpu.matmul %0, %5, %cst_6 {dimension_numbers = #tpu.dot_dimension_numbers<[1], [0], [0], [1], [0, 0, 1, 1], [], []>} : vector<32x128xbf16>, vector<128x128xbf16>, vector<32x128xf32> -> vector<32x128xf32>
    %c2 = arith.constant 2 : index
    %c0_7 = arith.constant 0 : index
    %c0_8 = arith.constant 0 : index
    %7 = vector.load %arg1[%c2, %c0_7, %c0_8] : memref<3x128x128xbf16, #tpu.memory_space<vmem>>, vector<1x128x128xbf16>
    %8 = vector.shape_cast %7 : vector<1x128x128xbf16> to vector<128x128xbf16>
    %cst_9 = arith.constant dense<0.000000e+00> : vector<32x128xf32>
    %9 = tpu.matmul %0, %8, %cst_9 {dimension_numbers = #tpu.dot_dimension_numbers<[1], [0], [0], [1], [0, 0, 1, 1], [], []>} : vector<32x128xbf16>, vector<128x128xbf16>, vector<32x128xf32> -> vector<32x128xf32>
    %10 = vector.shape_cast %3 : vector<32x128xf32> to vector<2x16x128xf32>
    %11 = vector.shape_cast %9 : vector<32x128xf32> to vector<2x16x128xf32>
    %12 = vector.extract_strided_slice %10 {offsets = [0, 15, 0], sizes = [2, 1, 128], strides = [1, 1, 1]} : vector<2x16x128xf32> to vector<2x1x128xf32>
    %13 = vector.extract_strided_slice %10 {offsets = [0, 0, 0], sizes = [2, 15, 128], strides = [1, 1, 1]} : vector<2x16x128xf32> to vector<2x15x128xf32>
    %14 = tpu.concatenate %12, %13 in 1 : vector<2x1x128xf32>, vector<2x15x128xf32> -> vector<2x16x128xf32>
    %15 = vector.extract_strided_slice %11 {offsets = [0, 1, 0], sizes = [2, 15, 128], strides = [1, 1, 1]} : vector<2x16x128xf32> to vector<2x15x128xf32>
    %16 = vector.extract_strided_slice %11 {offsets = [0, 0, 0], sizes = [2, 1, 128], strides = [1, 1, 1]} : vector<2x16x128xf32> to vector<2x1x128xf32>
    %17 = tpu.concatenate %15, %16 in 1 : vector<2x15x128xf32>, vector<2x1x128xf32> -> vector<2x16x128xf32>
    %18 = arith.addf %14, %17 : vector<2x16x128xf32>
    %19 = vector.shape_cast %18 : vector<2x16x128xf32> to vector<32x128xf32>
    %20 = arith.addf %6, %19 : vector<32x128xf32>
    %c0_10 = arith.constant 0 : index
    %c0_11 = arith.constant 0 : index
    %21 = vector.load %arg2[%c0_10, %c0_11] : memref<1x128xf32, #tpu.memory_space<vmem>>, vector<1x128xf32>
    %22 = vector.broadcast %21 : vector<1x128xf32> to vector<32x128xf32>
    %23 = arith.addf %20, %22 : vector<32x128xf32>
    %cst_12 = arith.constant 0.000000e+00 : f32
    %24 = vector.broadcast %cst_12 : f32 to vector<32x128xf32>
    %25 = arith.maximumf %23, %24 : vector<32x128xf32>
    %26 = arith.truncf %25 : vector<32x128xf32> to vector<32x128xbf16>
    %c0_13 = arith.constant 0 : index
    %c0_14 = arith.constant 0 : index
    %c0_15 = arith.constant 0 : index
    %27 = vector.load %arg3[%c0_13, %c0_14, %c0_15] : memref<3x128x128xbf16, #tpu.memory_space<vmem>>, vector<1x128x128xbf16>
    %28 = vector.shape_cast %27 : vector<1x128x128xbf16> to vector<128x128xbf16>
    %cst_16 = arith.constant dense<0.000000e+00> : vector<32x128xf32>
    %29 = tpu.matmul %26, %28, %cst_16 {dimension_numbers = #tpu.dot_dimension_numbers<[1], [0], [0], [1], [0, 0, 1, 1], [], []>} : vector<32x128xbf16>, vector<128x128xbf16>, vector<32x128xf32> -> vector<32x128xf32>
    %c1_17 = arith.constant 1 : index
    %c0_18 = arith.constant 0 : index
    %c0_19 = arith.constant 0 : index
    %30 = vector.load %arg3[%c1_17, %c0_18, %c0_19] : memref<3x128x128xbf16, #tpu.memory_space<vmem>>, vector<1x128x128xbf16>
    %31 = vector.shape_cast %30 : vector<1x128x128xbf16> to vector<128x128xbf16>
    %cst_20 = arith.constant dense<0.000000e+00> : vector<32x128xf32>
    %32 = tpu.matmul %26, %31, %cst_20 {dimension_numbers = #tpu.dot_dimension_numbers<[1], [0], [0], [1], [0, 0, 1, 1], [], []>} : vector<32x128xbf16>, vector<128x128xbf16>, vector<32x128xf32> -> vector<32x128xf32>
    %c2_21 = arith.constant 2 : index
    %c0_22 = arith.constant 0 : index
    %c0_23 = arith.constant 0 : index
    %33 = vector.load %arg3[%c2_21, %c0_22, %c0_23] : memref<3x128x128xbf16, #tpu.memory_space<vmem>>, vector<1x128x128xbf16>
    %34 = vector.shape_cast %33 : vector<1x128x128xbf16> to vector<128x128xbf16>
    %cst_24 = arith.constant dense<0.000000e+00> : vector<32x128xf32>
    %35 = tpu.matmul %26, %34, %cst_24 {dimension_numbers = #tpu.dot_dimension_numbers<[1], [0], [0], [1], [0, 0, 1, 1], [], []>} : vector<32x128xbf16>, vector<128x128xbf16>, vector<32x128xf32> -> vector<32x128xf32>
    %36 = vector.shape_cast %29 : vector<32x128xf32> to vector<2x16x128xf32>
    %37 = vector.shape_cast %35 : vector<32x128xf32> to vector<2x16x128xf32>
    %38 = vector.extract_strided_slice %36 {offsets = [0, 15, 0], sizes = [2, 1, 128], strides = [1, 1, 1]} : vector<2x16x128xf32> to vector<2x1x128xf32>
    %39 = vector.extract_strided_slice %36 {offsets = [0, 0, 0], sizes = [2, 15, 128], strides = [1, 1, 1]} : vector<2x16x128xf32> to vector<2x15x128xf32>
    %40 = tpu.concatenate %38, %39 in 1 : vector<2x1x128xf32>, vector<2x15x128xf32> -> vector<2x16x128xf32>
    %41 = vector.extract_strided_slice %37 {offsets = [0, 1, 0], sizes = [2, 15, 128], strides = [1, 1, 1]} : vector<2x16x128xf32> to vector<2x15x128xf32>
    %42 = vector.extract_strided_slice %37 {offsets = [0, 0, 0], sizes = [2, 1, 128], strides = [1, 1, 1]} : vector<2x16x128xf32> to vector<2x1x128xf32>
    %43 = tpu.concatenate %41, %42 in 1 : vector<2x15x128xf32>, vector<2x1x128xf32> -> vector<2x16x128xf32>
    %44 = arith.addf %40, %43 : vector<2x16x128xf32>
    %45 = vector.shape_cast %44 : vector<2x16x128xf32> to vector<32x128xf32>
    %46 = arith.addf %32, %45 : vector<32x128xf32>
    %c0_25 = arith.constant 0 : index
    %c0_26 = arith.constant 0 : index
    %47 = vector.load %arg4[%c0_25, %c0_26] : memref<1x128xf32, #tpu.memory_space<vmem>>, vector<1x128xf32>
    %48 = vector.broadcast %47 : vector<1x128xf32> to vector<32x128xf32>
    %49 = arith.addf %46, %48 : vector<32x128xf32>
    %cst_27 = arith.constant 0.000000e+00 : f32
    %50 = vector.broadcast %cst_27 : f32 to vector<32x128xf32>
    %51 = arith.maximumf %49, %50 : vector<32x128xf32>
    %cst_28 = arith.constant dense<0.000000e+00> : vector<128xf32>
    %52 = vector.multi_reduction <add>, %51, %cst_28 [0] : vector<32x128xf32> to vector<128xf32>
    %53 = vector.shape_cast %52 : vector<128xf32> to vector<1x128xf32>
    %c64_i32 = arith.constant 64 : i32
    %54 = tpu.dynamic_rotate %53 by %c64_i32 dim 1 : vector<1x128xf32>, i32 -> vector<1x128xf32>
    %55 = arith.addf %53, %54 : vector<1x128xf32>
    %c32_i32 = arith.constant 32 : i32
    %56 = tpu.dynamic_rotate %55 by %c32_i32 dim 1 : vector<1x128xf32>, i32 -> vector<1x128xf32>
    %57 = arith.addf %55, %56 : vector<1x128xf32>
    %c16_i32 = arith.constant 16 : i32
    %58 = tpu.dynamic_rotate %57 by %c16_i32 dim 1 : vector<1x128xf32>, i32 -> vector<1x128xf32>
    %59 = arith.addf %57, %58 : vector<1x128xf32>
    %c8_i32 = arith.constant 8 : i32
    %60 = tpu.dynamic_rotate %59 by %c8_i32 dim 1 : vector<1x128xf32>, i32 -> vector<1x128xf32>
    %61 = arith.addf %59, %60 : vector<1x128xf32>
    %cst_29 = arith.constant 0.001953125 : f32
    %62 = vector.broadcast %cst_29 : f32 to vector<1x128xf32>
    %63 = arith.mulf %61, %62 : vector<1x128xf32>
    %64 = vector.broadcast %63 : vector<1x128xf32> to vector<32x128xf32>
    %65 = arith.subf %51, %64 : vector<32x128xf32>
    %66 = arith.mulf %65, %65 : vector<32x128xf32>
    %cst_30 = arith.constant dense<0.000000e+00> : vector<128xf32>
    %67 = vector.multi_reduction <add>, %66, %cst_30 [0] : vector<32x128xf32> to vector<128xf32>
    %68 = vector.shape_cast %67 : vector<128xf32> to vector<1x128xf32>
    %c64_i32_31 = arith.constant 64 : i32
    %69 = tpu.dynamic_rotate %68 by %c64_i32_31 dim 1 : vector<1x128xf32>, i32 -> vector<1x128xf32>
    %70 = arith.addf %68, %69 : vector<1x128xf32>
    %c32_i32_32 = arith.constant 32 : i32
    %71 = tpu.dynamic_rotate %70 by %c32_i32_32 dim 1 : vector<1x128xf32>, i32 -> vector<1x128xf32>
    %72 = arith.addf %70, %71 : vector<1x128xf32>
    %c16_i32_33 = arith.constant 16 : i32
    %73 = tpu.dynamic_rotate %72 by %c16_i32_33 dim 1 : vector<1x128xf32>, i32 -> vector<1x128xf32>
    %74 = arith.addf %72, %73 : vector<1x128xf32>
    %c8_i32_34 = arith.constant 8 : i32
    %75 = tpu.dynamic_rotate %74 by %c8_i32_34 dim 1 : vector<1x128xf32>, i32 -> vector<1x128xf32>
    %76 = arith.addf %74, %75 : vector<1x128xf32>
    %cst_35 = arith.constant 0.001953125 : f32
    %77 = vector.broadcast %cst_35 : f32 to vector<1x128xf32>
    %78 = arith.mulf %76, %77 : vector<1x128xf32>
    %c0_36 = arith.constant 0 : index
    %c0_37 = arith.constant 0 : index
    %79 = vector.load %arg5[%c0_36, %c0_37] : memref<1x128xf32, #tpu.memory_space<vmem>>, vector<1x128xf32>
    %cst_38 = arith.constant 9.99999974E-6 : f32
    %80 = vector.broadcast %cst_38 : f32 to vector<1x128xf32>
    %81 = arith.addf %78, %80 : vector<1x128xf32>
    %82 = math.rsqrt %81 : vector<1x128xf32>
    %83 = arith.mulf %79, %82 : vector<1x128xf32>
    %c0_39 = arith.constant 0 : index
    %c0_40 = arith.constant 0 : index
    %84 = vector.load %arg6[%c0_39, %c0_40] : memref<1x128xf32, #tpu.memory_space<vmem>>, vector<1x128xf32>
    %85 = arith.mulf %63, %83 : vector<1x128xf32>
    %86 = arith.subf %84, %85 : vector<1x128xf32>
    %87 = vector.broadcast %83 : vector<1x128xf32> to vector<32x128xf32>
    %88 = arith.mulf %51, %87 : vector<32x128xf32>
    %89 = vector.broadcast %86 : vector<1x128xf32> to vector<32x128xf32>
    %90 = arith.addf %88, %89 : vector<32x128xf32>
    %c0_41 = arith.constant 0 : index
    %c0_42 = arith.constant 0 : index
    %91 = vector.load %arg7[%c0_41, %c0_42] : memref<32x128xf32, #tpu.memory_space<vmem>>, vector<32x128xf32>
    tpu.vector_store %arg7[%c0_41, %c0_42], %90 {strides = array<i32>} : memref<32x128xf32, #tpu.memory_space<vmem>>, vector<32x128xf32>,
    return
  }
}

</mosaic_0001>

<bundles_post_ra>
// kernel: sn_conv_block_forward.1
= control target key start
LH: loop header
LB: loop body
LE: loop exit
PB: predicated region body
PF: predicated region fallthrough
CT: control target
= control target key end

     0   :  { %vm295_vm0 = vcmask 1040384   ;;  %vm310_vm1 = vcmask 1046528   ;;  %s1283_s29 = smov 32   ;;  %s1284_s30 = smov 16   ;;  %s1544_s1 = inlined_call_operand.vmem [shape: bf16[3,128,128], index: 1, kind: input, shape index: {}]   ;;  %s1545_s0 = inlined_call_operand.vmem [shape: bf16[32,128], index: 0, kind: input, shape index: {}]   ;;  %s1546_s3 = inlined_call_operand.vmem [shape: bf16[3,128,128], index: 3, kind: input, shape index: {}]   ;;  %s1547_s2 = inlined_call_operand.vmem [shape: f32[1,128], index: 2, kind: input, shape index: {}]   ;;  %s1548_s4 = inlined_call_operand.vmem [shape: f32[1,128], index: 4, kind: input, shape index: {}]   ;;  %s1549_s5 = inlined_call_operand.vmem [shape: f32[1,128], index: 5, kind: input, shape index: {}]   ;;  %s1550_s6 = inlined_call_operand.vmem [shape: f32[1,128], index: 6, kind: input, shape index: {}]   ;;  %s1551_s7 = inlined_call_operand.vmem [shape: f32[32,128], index: 7, kind: output, shape index: {}]  }
   0x1   :  { %v1230_v0 = vld [vmem:[%s1544_s1] sm:$0xff]   ;;  %v1232_v2 = vld [vmem:[%s1544_s1 + $0x8] sm:$0xff]   ;;  %v1234_v4 = vld [vmem:[%s1544_s1 + $0x10] sm:$0xff]   ;;  %s1285_s8 = smov 8  }
   0x2   :  { %v1231_v1 = vld [vmem:[%s1544_s1 + $0x80] sm:$0xff]   ;;  %1106 = vmatprep.subr.bf16.mxu0 %v1230_v0  ;;  %v1233_v3 = vld [vmem:[%s1544_s1 + $0x88] sm:$0xff]   ;;  %v1235_v5 = vld [vmem:[%s1544_s1 + $0x90] sm:$0xff]  }
   0x3   :  { %1126 = vmatprep.subr.bf16.mxu1 %v1231_v1  ;;  %1107 = vmatpush3.bf16.msra.mxu0 %v1230_v0  ;;  %v1236_v6 = vld [vmem:[%s1544_s1 + $0x18] sm:$0xff]   ;;  %v1238_v8 = vld [vmem:[%s1544_s1 + $0x20] sm:$0xff]   ;;  %v1240_v10 = vld [vmem:[%s1544_s1 + $0x28] sm:$0xff]  }
   0x4   :  { %1127 = vmatpush3.bf16.msra.mxu1 %v1231_v1  ;;  %1108 = vmatprep.subr.bf16.mxu0 %v1232_v2  ;;  %v1237_v7 = vld [vmem:[%s1544_s1 + $0x98] sm:$0xff]   ;;  %v1239_v9 = vld [vmem:[%s1544_s1 + $0xa0] sm:$0xff]   ;;  %v1241_v12 = vld [vmem:[%s1544_s1 + $0xa8] sm:$0xff]  }
   0x5   :  { %1128 = vmatprep.subr.bf16.mxu1 %v1233_v3  ;;  %v1246_v11 = vld [vmem:[%s1545_s0] sm:$0xff]   ;;  %v1242_v13 = vld [vmem:[%s1544_s1 + $0x30] sm:$0xff]   ;;  %v1244_v15 = vld [vmem:[%s1544_s1 + $0x38] sm:$0xff]  }
   0x6   :  { %1122 = vmatprep.mubr.bf16.mxu0 %v1246_v11  ;;  %1142 = vmatprep.mubr.bf16.mxu1 %v1246_v11  ;;  %v1243_v14 = vld [vmem:[%s1544_s1 + $0xb0] sm:$0xff]   ;;  %v1245_v16 = vld [vmem:[%s1544_s1 + $0xb8] sm:$0xff]   ;;  %v1248_v17 = vld [vmem:[%s1544_s1 + $0x40] sm:$0xff]  }
   0x7   :  { %1109 = vmatpush3.bf16.msra.mxu0 %v1232_v2  ;;  %v1247_v18 = vld [vmem:[%s1545_s0 + $0x8] sm:$0xff]   ;;  %v1250_v20 = vld [vmem:[%s1544_s1 + $0x50] sm:$0xff]   ;;  %v1251_v21 = vld [vmem:[%s1544_s1 + $0x58] sm:$0xff]  }
   0x8   :  { %1129 = vmatpush3.bf16.msra.mxu1 %v1233_v3  ;;  %1110 = vmatprep.subr.bf16.mxu0 %v1234_v4  ;;  %v1249_v19 = vld [vmem:[%s1544_s1 + $0x48] sm:$0xff]   ;;  %v1252_v22 = vld [vmem:[%s1544_s1 + $0x60] sm:$0xff]   ;;  %v1254_v24 = vld [vmem:[%s1544_s1 + $0x70] sm:$0xff]  }
   0x9   :  { %1130 = vmatprep.subr.bf16.mxu1 %v1235_v5  ;;  %v1253_v23 = vld [vmem:[%s1544_s1 + $0x68] sm:$0xff]   ;;  %v1255_v25 = vld [vmem:[%s1544_s1 + $0x78] sm:$0xff]   ;;  %v1256_v26 = vld [vmem:[%s1546_s3] sm:$0xff]  }
   0xa   :  { %v1257_v27 = vld [vmem:[%s1546_s3 + $0x80] sm:$0xff]   ;;  %v1258_v28 = vld [vmem:[%s1546_s3 + $0x8] sm:$0xff]   ;;  %v1260_v30 = vld [vmem:[%s1546_s3 + $0x10] sm:$0xff]  }
   0xb   :  { %1111 = vmatpush3.bf16.msra.mxu0 %v1234_v4  ;;  %v1259_v29 = vld [vmem:[%s1546_s3 + $0x88] sm:$0xff]   ;;  %v1261_v31 = vld [vmem:[%s1546_s3 + $0x90] sm:$0xff]   ;;  %v1262_v32 = vld [vmem:[%s1546_s3 + $0x18] sm:$0xff]  }
   0xc   :  { %1131 = vmatpush3.bf16.msra.mxu1 %v1235_v5  ;;  %1112 = vmatprep.subr.bf16.mxu0 %v1236_v6  ;;  %v1263_v33 = vld [vmem:[%s1546_s3 + $0x98] sm:$0xff]   ;;  %v1264_v34 = vld [vmem:[%s1546_s3 + $0x20] sm:$0xff]   ;;  %v1266_v36 = vld [vmem:[%s1546_s3 + $0x28] sm:$0xff]  }
   0xd   :  { %1132 = vmatprep.subr.bf16.mxu1 %v1237_v7  ;;  %v1265_v35 = vld [vmem:[%s1546_s3 + $0xa0] sm:$0xff]   ;;  %v1267_v37 = vld [vmem:[%s1546_s3 + $0xa8] sm:$0xff]   ;;  %v1268_v38 = vld [vmem:[%s1546_s3 + $0x30] sm:$0xff]  }
   0xe   :  { %v1269_v39 = vld [vmem:[%s1546_s3 + $0xb0] sm:$0xff]   ;;  %v1270_v40 = vld [vmem:[%s1546_s3 + $0x38] sm:$0xff]   ;;  %v1272_v42 = vld [vmem:[%s1546_s3 + $0x40] sm:$0xff]  }
   0xf   :  { %1113 = vmatpush3.bf16.msra.mxu0 %v1236_v6  ;;  %v1271_v41 = vld [vmem:[%s1546_s3 + $0xb8] sm:$0xff]  }
  0x10   :  { %1133 = vmatpush3.bf16.msra.mxu1 %v1237_v7  ;;  %1114 = vmatprep.subr.bf16.mxu0 %v1238_v8 }
  0x11   :  { %1134 = vmatprep.subr.bf16.mxu1 %v1239_v9 }
  0x13   :  { %1115 = vmatpush3.bf16.msra.mxu0 %v1238_v8  ;;  %v988_v8 = vld [vmem:[%s1547_s2] ss:$0 sm:$0xff] }
  0x14   :  { %1135 = vmatpush3.bf16.msra.mxu1 %v1239_v9  ;;  %1116 = vmatprep.subr.bf16.mxu0 %v1240_v10 }
  0x15   :  { %1136 = vmatprep.subr.bf16.mxu1 %v1241_v12 }
  0x17   :  { %1117 = vmatpush3.bf16.msra.mxu0 %v1240_v10 }
  0x18   :  { %1137 = vmatpush3.bf16.msra.mxu1 %v1241_v12  ;;  %1118 = vmatprep.subr.bf16.mxu0 %v1242_v13 }
  0x19   :  { %1138 = vmatprep.subr.bf16.mxu1 %v1243_v14 }
  0x1b   :  { %1119 = vmatpush3.bf16.msra.mxu0 %v1242_v13 }
  0x1c   :  { %1139 = vmatpush3.bf16.msra.mxu1 %v1243_v14  ;;  %1120 = vmatprep.subr.bf16.mxu0 %v1244_v15 }
  0x1d   :  { %1140 = vmatprep.subr.bf16.mxu1 %v1245_v16 }
  0x1f   :  { %1121 = vmatpush3.bf16.msra.mxu0 %v1244_v15 }
  0x20   :  { %1141 = vmatpush3.bf16.msra.mxu1 %v1245_v16  ;;  %1146 = vmatprep.subr.bf16.mxu0 %v1248_v17 }
  0x21   :  { %1166 = vmatprep.subr.bf16.mxu1 %v1256_v26 }
  0x22   :  { %1123 = vmatmul.mubr.bf16.vlgmr.msra.gmra.mrb[0].mxu0 %v1247_v18 }
  0x23   :  { %1143 = vmatmul.mubr.bf16.vlgmr.msra.gmra.mrb[0].mxu1 %v1247_v18  ;;  %1147 = vmatpush3.bf16.msra.mxu0 %v1248_v17 }
  0x24   :  { %1148 = vmatprep.subr.bf16.mxu0 %v1249_v19  ;;  %1162 = vmatprep.mubr.bf16.mxu0 %v1246_v11 }
  0x25   :  { %1167 = vmatpush3.bf16.msra.mxu1 %v1256_v26  ;;  %v1273_v26 = vld [vmem:[%s1546_s3 + $0x48] sm:$0xff]  }
  0x26   :  { %1168 = vmatprep.subr.bf16.mxu1 %v1258_v28 }
  0x27   :  { %1149 = vmatpush3.bf16.msra.mxu0 %v1249_v19 }
  0x28   :  { %1150 = vmatprep.subr.bf16.mxu0 %v1250_v20 }
  0x29   :  { %1169 = vmatpush3.bf16.msra.mxu1 %v1258_v28  ;;  %v1275_v28 = vld [vmem:[%s1546_s3 + $0x58] sm:$0xff]  }
  0x2a   :  { %1170 = vmatprep.subr.bf16.mxu1 %v1260_v30 }
  0x2b   :  { %1151 = vmatpush3.bf16.msra.mxu0 %v1250_v20 }
  0x2c   :  { %1152 = vmatprep.subr.bf16.mxu0 %v1251_v21 }
  0x2d   :  { %1171 = vmatpush3.bf16.msra.mxu1 %v1260_v30  ;;  %v1277_v30 = vld [vmem:[%s1546_s3 + $0x68] sm:$0xff]  }
  0x2e   :  { %1172 = vmatprep.subr.bf16.mxu1 %v1262_v32 }
  0x2f   :  { %1153 = vmatpush3.bf16.msra.mxu0 %v1251_v21 }
  0x30   :  { %1154 = vmatprep.subr.bf16.mxu0 %v1252_v22 }
  0x31   :  { %1173 = vmatpush3.bf16.msra.mxu1 %v1262_v32  ;;  %v1279_v32 = vld [vmem:[%s1546_s3 + $0x78] sm:$0xff]  }
  0x32   :  { %1174 = vmatprep.subr.bf16.mxu1 %v1264_v34 }
  0x33   :  { %1155 = vmatpush3.bf16.msra.mxu0 %v1252_v22 }
  0x34   :  { %1156 = vmatprep.subr.bf16.mxu0 %v1253_v23 }
  0x35   :  { %1175 = vmatpush3.bf16.msra.mxu1 %v1264_v34 }
  0x36   :  { %1176 = vmatprep.subr.bf16.mxu1 %v1266_v36 }
  0x37   :  { %1157 = vmatpush3.bf16.msra.mxu0 %v1253_v23 }
  0x38   :  { %1158 = vmatprep.subr.bf16.mxu0 %v1254_v24 }
  0x39   :  { %1177 = vmatpush3.bf16.msra.mxu1 %v1266_v36 }
  0x3a   :  { %1178 = vmatprep.subr.bf16.mxu1 %v1268_v38 }
  0x3b   :  { %1159 = vmatpush3.bf16.msra.mxu0 %v1254_v24 }
  0x3c   :  { %1160 = vmatprep.subr.bf16.mxu0 %v1255_v25 }
  0x3d   :  { %1179 = vmatpush3.bf16.msra.mxu1 %v1268_v38 }
  0x3e   :  { %1180 = vmatprep.subr.bf16.mxu1 %v1270_v40 }
  0x3f   :  { %1161 = vmatpush3.bf16.msra.mxu0 %v1255_v25 }
  0x40   :  { %1186 = vmatprep.subr.bf16.mxu0 %v1257_v27 }
  0x41   :  { %1181 = vmatpush3.bf16.msra.mxu1 %v1270_v40 }
  0x42   :  { %1163 = vmatmul.mubr.bf16.vlgmr.msra.gmra.mrb[4].mxu0 %v1247_v18  ;;  %1206 = vmatprep.subr.bf16.mxu1 %v1272_v42 }
  0x43   :  { %1187 = vmatpush3.bf16.msra.mxu0 %v1257_v27  ;;  %v1274_v27 = vld [vmem:[%s1546_s3 + $0x50] sm:$0xff]  }
  0x44   :  { %1188 = vmatprep.subr.bf16.mxu0 %v1259_v29 }
  0x47   :  { %1189 = vmatpush3.bf16.msra.mxu0 %v1259_v29  ;;  %v1276_v29 = vld [vmem:[%s1546_s3 + $0x60] sm:$0xff]  }
  0x48   :  { %1190 = vmatprep.subr.bf16.mxu0 %v1261_v31 }
  0x4b   :  { %1191 = vmatpush3.bf16.msra.mxu0 %v1261_v31  ;;  %v1278_v31 = vld [vmem:[%s1546_s3 + $0x70] sm:$0xff]  }
  0x4c   :  { %1192 = vmatprep.subr.bf16.mxu0 %v1263_v33 }
  0x4f   :  { %1193 = vmatpush3.bf16.msra.mxu0 %v1263_v33 }
  0x50   :  { %1194 = vmatprep.subr.bf16.mxu0 %v1265_v35 }
  0x53   :  { %1195 = vmatpush3.bf16.msra.mxu0 %v1265_v35 }
  0x54   :  { %1196 = vmatprep.subr.bf16.mxu0 %v1267_v37 }
  0x57   :  { %1197 = vmatpush3.bf16.msra.mxu0 %v1267_v37 }
  0x58   :  { %1198 = vmatprep.subr.bf16.mxu0 %v1269_v39 }
  0x5b   :  { %1199 = vmatpush3.bf16.msra.mxu0 %v1269_v39 }
  0x5c   :  { %1200 = vmatprep.subr.bf16.mxu0 %v1271_v41 }
  0x5f   :  { %1201 = vmatpush3.bf16.msra.mxu0 %v1271_v41 }
  0xf5   :  { %v1124_v43 = vpop.f32.mrb[0].mxu0 }
  0xf6   :  { %v298_v44 = vrot.slane %v1124_v43, 7  ;;  %v1144_v45 = vpop.f32.mrb[0].mxu1  ;;  %v141_v46 = vpop.f32.mrb[1].mxu0 }
  0xf7   :  { %v314_v47 = vrot.slane %v1144_v45, 1  ;;  %v272_v48 = vpop.f32.mrb[1].mxu1  ;;  %v1125_v49 = vpop.f32.mrb[2].mxu0  ;;  %v296_v54 = vrot.slane %v141_v46, 7 }
  0xf8   :  { %v311_v50 = vrot.slane %v272_v48, 1  ;;  %v290_v51 = vrot.slane %v1125_v49, 7  ;;  %v1145_v52 = vpop.f32.mrb[2].mxu1  ;;  %v144_v53 = vpop.f32.mrb[3].mxu0 }
  0xf9   :  { %v315_v55 = vrot.slane %v1145_v52, 1  ;;  %v289_v56 = vrot.slane %v144_v53, 7  ;;  %v275_v57 = vpop.f32.mrb[3].mxu1 }
  0xfa   :  { %v312_v58 = vrot.slane %v275_v57, 1  ;;  %v305_v59 = vsel %vm295_vm0, %v290_v51, %v298_v44  ;;  %v299_v60 = vsel %vm295_vm0, %v298_v44, %v290_v51 }
  0xfb   :  { %v316_v61 = vsel %vm310_vm1, %v314_v47, %v315_v55  ;;  %v304_v62 = vsel %vm295_vm0, %v289_v56, %v296_v54  ;;  %v324_v63 = vsel %vm310_vm1, %v315_v55, %v314_v47  ;;  %v297_v0 = vsel %vm295_vm0, %v296_v54, %v289_v56 }
  0xfc   :  { %v327_v1 = vadd.f32 %v316_v61, %v305_v59  ;;  %v313_v2 = vsel %vm310_vm1, %v311_v50, %v312_v58  ;;  %v328_v3 = vadd.f32 %v324_v63, %v299_v60  ;;  %v323_v4 = vsel %vm310_vm1, %v312_v58, %v311_v50  ;;  %v1045_v63 = vld [vmem:[%s1548_s4] ss:$0 sm:$0xff]  ;;  %s1282_s4 = smov 64  }
  0xfd   :  { %v325_v5 = vadd.f32 %v313_v2, %v304_v62  ;;  %v326_v6 = vadd.f32 %v323_v4, %v297_v0 }
 0x115   :  { %v1164_v7 = vpop.f32.mrb[4].mxu0 }
 0x116   :  { %v420_v9 = vadd.f32 %v1164_v7, %v327_v1  ;;  %v411_v10 = vpop.f32.mrb[5].mxu0 }
 0x117   :  { %v412_v11 = vadd.f32 %v411_v10, %v325_v5  ;;  %v1165_v12 = vpop.f32.mrb[6].mxu0 }
 0x118   :  { %v435_v13 = vadd.f32 %v988_v8, %v420_v9  ;;  %v423_v14 = vadd.f32 %v1165_v12, %v328_v3  ;;  %v414_v15 = vpop.f32.mrb[7].mxu0 }
 0x119   :  { %v433_v16 = vadd.f32 %v988_v8, %v412_v11  ;;  %v415_v17 = vadd.f32 %v414_v15, %v326_v6 }
 0x11a   :  { %v436_v18 = vadd.f32 %v988_v8, %v423_v14  ;;  %v439_v20 = vmax.f32 %v435_v13, 0.0 }
 0x11b   :  { %v434_v19 = vadd.f32 %v988_v8, %v415_v17  ;;  %v437_v22 = vmax.f32 %v433_v16, 0.0 }
 0x11c   :  { %v440_v21 = vmax.f32 %v436_v18, 0.0 }
 0x11d   :  { %v438_v23 = vmax.f32 %v434_v19, 0.0 }
 0x11e   :  { %v442_v24 = vpack.c.bf16 %v440_v21, %v439_v20 }
 0x11f   :  { %v441_v25 = vpack.c.bf16 %v438_v23, %v437_v22 }
 0x121   :  { %1182 = vmatprep.mubr.bf16.mxu1 %v441_v25  ;;  %1202 = vmatprep.mubr.bf16.mxu0 %v441_v25 }
 0x122   :  { %1183 = vmatmul.mubr.bf16.vlgmr.msra.gmra.mrb[4].mxu1 %v442_v24  ;;  %1203 = vmatmul.mubr.bf16.vlgmr.msra.gmra.mrb[8].mxu0 %v442_v24 }
 0x123   :  { %1207 = vmatpush3.bf16.msra.mxu1 %v1272_v42  ;;  %1222 = vmatprep.mubr.bf16.mxu1 %v441_v25 }
 0x124   :  { %1208 = vmatprep.subr.bf16.mxu1 %v1273_v26 }
 0x127   :  { %1209 = vmatpush3.bf16.msra.mxu1 %v1273_v26 }
 0x128   :  { %1210 = vmatprep.subr.bf16.mxu1 %v1274_v27 }
 0x12b   :  { %1211 = vmatpush3.bf16.msra.mxu1 %v1274_v27 }
 0x12c   :  { %1212 = vmatprep.subr.bf16.mxu1 %v1275_v28 }
 0x12f   :  { %1213 = vmatpush3.bf16.msra.mxu1 %v1275_v28 }
 0x130   :  { %1214 = vmatprep.subr.bf16.mxu1 %v1276_v29 }
 0x133   :  { %1215 = vmatpush3.bf16.msra.mxu1 %v1276_v29  ;;  %v861_v29 = vlaneseq }
 0x134   :  { %1216 = vmatprep.subr.bf16.mxu1 %v1277_v30 }
 0x137   :  { %1217 = vmatpush3.bf16.msra.mxu1 %v1277_v30  ;;  %v862_v30 = vshrl.u32 %v861_v29, 7 }
 0x138   :  { %1218 = vmatprep.subr.bf16.mxu1 %v1278_v31 }
 0x13b   :  { %1219 = vmatpush3.bf16.msra.mxu1 %v1278_v31 }
 0x13c   :  { %1220 = vmatprep.subr.bf16.mxu1 %v1279_v32 }
 0x13f   :  { %1221 = vmatpush3.bf16.msra.mxu1 %v1279_v32  ;;  %v863_v32 = vsub.s32 0, %v862_v30 }
 0x142   :  { %1223 = vmatmul.mubr.bf16.vlgmr.msra.gmra.mrb[8].mxu1 %v442_v24 }
 0x1f5   :  { %v1184_v33 = vpop.f32.mrb[4].mxu1  ;;  %v1204_v34 = vpop.f32.mrb[8].mxu0 }
 0x1f6   :  { %v541_v35 = vpop.f32.mrb[5].mxu1  ;;  %v672_v36 = vpop.f32.mrb[9].mxu0  ;;  %v697_v39 = vrot.slane %v1184_v33, 7  ;;  %v712_v40 = vrot.slane %v1204_v34, 1 }
 0x1f7   :  { %v1185_v37 = vpop.f32.mrb[6].mxu1  ;;  %v1205_v38 = vpop.f32.mrb[10].mxu0  ;;  %v695_v45 = vrot.slane %v541_v35, 7  ;;  %v709_v46 = vrot.slane %v672_v36, 1 }
 0x1f8   :  { %v690_v41 = vrot.slane %v1185_v37, 7  ;;  %v713_v42 = vrot.slane %v1205_v38, 1  ;;  %v544_v43 = vpop.f32.mrb[7].mxu1  ;;  %v675_v44 = vpop.f32.mrb[11].mxu0 }
 0x1f9   :  { %v689_v47 = vrot.slane %v544_v43, 7  ;;  %v710_v48 = vrot.slane %v675_v44, 1 }
 0x1fa   :  { %v704_v49 = vsel %vm295_vm0, %v690_v41, %v697_v39  ;;  %v714_v50 = vsel %vm310_vm1, %v712_v40, %v713_v42  ;;  %v698_v51 = vsel %vm295_vm0, %v697_v39, %v690_v41  ;;  %v722_v52 = vsel %vm310_vm1, %v713_v42, %v712_v40 }
 0x1fb   :  { %v725_v53 = vadd.f32 %v714_v50, %v704_v49  ;;  %v703_v54 = vsel %vm295_vm0, %v689_v47, %v695_v45  ;;  %v711_v55 = vsel %vm310_vm1, %v709_v46, %v710_v48  ;;  %v726_v56 = vadd.f32 %v722_v52, %v698_v51 }
 0x1fc   :  { %v723_v57 = vadd.f32 %v711_v55, %v703_v54  ;;  %v696_v58 = vsel %vm295_vm0, %v695_v45, %v689_v47  ;;  %v721_v59 = vsel %vm310_vm1, %v710_v48, %v709_v46 }
 0x1fd   :  { %v724_v60 = vadd.f32 %v721_v59, %v696_v58 }
 0x215   :  { %v1224_v61 = vpop.f32.mrb[8].mxu1 }
 0x216   :  { %v818_v62 = vadd.f32 %v1224_v61, %v725_v53  ;;  %v809_v0 = vpop.f32.mrb[9].mxu1 }
 0x217   :  { %v810_v1 = vadd.f32 %v809_v0, %v723_v57  ;;  %v1225_v2 = vpop.f32.mrb[10].mxu1 }
 0x218   :  { %v821_v3 = vadd.f32 %v1225_v2, %v726_v56  ;;  %v812_v4 = vpop.f32.mrb[11].mxu1  ;;  %v833_v7 = vadd.f32 %v1045_v63, %v818_v62  ;;  %v899_v2 = vld [vmem:[%s1550_s6] sm:$0x1] }
 0x219   :  { %v831_v5 = vadd.f32 %v1045_v63, %v810_v1  ;;  %v813_v6 = vadd.f32 %v812_v4, %v724_v60 }
 0x21a   :  { %v834_v10 = vadd.f32 %v1045_v63, %v821_v3  ;;  %v1502_v12 = vmax.f32 %v833_v7, 0.0 }
 0x21b   :  { %v832_v8 = vadd.f32 %v1045_v63, %v813_v6  ;;  %v1498_v9 = vmax.f32 %v831_v5, 0.0  ;;  %v895_v63 = vld [vmem:[%s1549_s5] sm:$0x1] }
 0x21c   :  { %v1506_v14 = vmax.f32 %v834_v10, 0.0 }
 0x21d   :  { %v1500_v11 = vmax.f32 %v832_v8, 0.0 }
 0x21f   :  { %v839_v13 = vadd.f32 %v1500_v11, %v1498_v9 }
 0x221   :  { %v840_v15 = vadd.f32 %v839_v13, %v1502_v12 }
 0x223   :  { %v841_v16 = vadd.f32 %v840_v15, %v1506_v14 }
 0x225   :  { %v842_v17 = vrot.slane %v841_v16, 4 }
 0x227   :  { %v843_v18 = vadd.f32 %v842_v17, %v841_v16 }
 0x229   :  { %v844_v19 = vrot.slane %v843_v18, 2 }
 0x22b   :  { %v845_v20 = vadd.f32 %v844_v19, %v843_v18 }
 0x22d   :  { %v846_v21 = vrot.slane %v845_v20, 1 }
 0x22f   :  { %v847_v22 = vadd.f32 %v846_v21, %v845_v20 }
 0x231   :  { %848 = vrot.lane.b32.xlu0 %v847_v22, %s1282_s4 }
 0x2a3   :  { %v849_v23 = vpop.permute.xlu0 %848 }
 0x2a4   :  { %v850_v24 = vadd.f32 %v849_v23, %v847_v22 }
 0x2a6   :  { %851 = vrot.lane.b32.xlu0 %v850_v24, %s1283_s29 }
 0x318   :  { %v852_v25 = vpop.permute.xlu0 %851 }
 0x319   :  { %v853_v26 = vadd.f32 %v852_v25, %v850_v24 }
 0x31b   :  { %854 = vrot.lane.b32.xlu1 %v853_v26, %s1284_s30 }
 0x38d   :  { %v855_v27 = vpop.permute.xlu1 %854 }
 0x38e   :  { %v856_v28 = vadd.f32 %v855_v27, %v853_v26 }
 0x390   :  { %857 = vrot.lane.b32.xlu1 %v856_v28, %s1285_s8 }
 0x402   :  { %v858_v31 = vpop.permute.xlu1 %857 }
 0x403   :  { %v859_v33 = vadd.f32 %v858_v31, %v856_v28 }
 0x405   :  { %v860_v34 = vmul.f32 0.001953125, %v859_v33 }
 0x407   :  { %v864_v35 = vrot.slane %v860_v34, %v863_v32 }
 0x409   :  { %v865_v36 = vsub.f32 %v1498_v9, %v864_v35  ;;  %v866_v37 = vsub.f32 %v1500_v11, %v864_v35  ;;  %v867_v38 = vsub.f32 %v1502_v12, %v864_v35  ;;  %v868_v39 = vsub.f32 %v1506_v14, %v864_v35 }
 0x40b   :  { %v869_v40 = vmul.f32 %v865_v36, %v865_v36  ;;  %v870_v41 = vmul.f32 %v866_v37, %v866_v37  ;;  %v871_v42 = vmul.f32 %v867_v38, %v867_v38  ;;  %v872_v44 = vmul.f32 %v868_v39, %v868_v39 }
 0x40d   :  { %v873_v43 = vadd.f32 %v870_v41, %v869_v40 }
 0x40f   :  { %v874_v45 = vadd.f32 %v873_v43, %v871_v42 }
 0x411   :  { %v875_v46 = vadd.f32 %v874_v45, %v872_v44 }
 0x413   :  { %v876_v47 = vrot.slane %v875_v46, 4 }
 0x415   :  { %v877_v48 = vadd.f32 %v876_v47, %v875_v46 }
 0x417   :  { %v878_v49 = vrot.slane %v877_v48, 2 }
 0x419   :  { %v879_v50 = vadd.f32 %v878_v49, %v877_v48 }
 0x41b   :  { %v880_v51 = vrot.slane %v879_v50, 1 }
 0x41d   :  { %v881_v52 = vadd.f32 %v880_v51, %v879_v50 }
 0x41f   :  { %882 = vrot.lane.b32.xlu0 %v881_v52, %s1282_s4 }
 0x491   :  { %v883_v53 = vpop.permute.xlu0 %882 }
 0x492   :  { %v884_v54 = vadd.f32 %v883_v53, %v881_v52 }
 0x494   :  { %885 = vrot.lane.b32.xlu1 %v884_v54, %s1283_s29 }
 0x506   :  { %v886_v55 = vpop.permute.xlu1 %885 }
 0x507   :  { %v887_v56 = vadd.f32 %v886_v55, %v884_v54 }
 0x509   :  { %888 = vrot.lane.b32.xlu0 %v887_v56, %s1284_s30 }
 0x57b   :  { %v889_v57 = vpop.permute.xlu0 %888 }
 0x57c   :  { %v890_v58 = vadd.f32 %v889_v57, %v887_v56 }
 0x57e   :  { %891 = vrot.lane.b32.xlu1 %v890_v58, %s1285_s8 }
 0x5f0   :  { %v892_v59 = vpop.permute.xlu1 %891 }
 0x5f1   :  { %v893_v60 = vadd.f32 %v892_v59, %v890_v58 }
 0x5f3   :  { %v894_v61 = vmul.f32 0.001953125, %v893_v60 }
 0x5f5   :  { %v896_v62 = vadd.f32 1e-05, %v894_v61 }
 0x5f7   :  { %1280 = vrsqrt.f32 %v896_v62 }
 0x601   :  { %v1281_v0 = vpop.eup %1280 }
 0x602   :  { %v898_v1 = vmul.f32 %v1281_v0, %v895_v63 }
 0x604   :  { %v900_v3 = vmul.f32 %v898_v1, %v860_v34  ;;  %v906_v4 = vrot.slane %v898_v1, %v863_v32 }
 0x606   :  { %v901_v5 = vsub.f32 %v899_v2, %v900_v3  ;;  %v908_v6 = vmul.f32 %v906_v4, %v1498_v9  ;;  %v909_v7 = vmul.f32 %v906_v4, %v1500_v11  ;;  %v910_v8 = vmul.f32 %v906_v4, %v1502_v12 }
 0x607   :  { %v911_v10 = vmul.f32 %v906_v4, %v1506_v14 }
 0x608   :  { %v916_v13 = vrot.slane %v901_v5, %v863_v32 }
 0x60a   :  { %v918_v15 = vadd.f32 %v916_v13, %v908_v6  ;;  %v919_v16 = vadd.f32 %v916_v13, %v909_v7  ;;  %v920_v17 = vadd.f32 %v916_v13, %v910_v8  ;;  %v921_v18 = vadd.f32 %v916_v13, %v911_v10 }
 0x60c   :  { %922 = vst [vmem:[%s1551_s7] sm:$0xff] %v918_v15  ;;  %923 = vst [vmem:[%s1551_s7 + $0x8] sm:$0xff] %v919_v16 }
 0x60d   :  { %924 = vst [vmem:[%s1551_s7 + $0x10] sm:$0xff] %v920_v17  ;;  %925 = vst [vmem:[%s1551_s7 + $0x18] sm:$0xff] %v921_v18 }

</bundles_post_ra>
